<compile_context>
chip_gen: v7x
topology: tpu7x:2x2x1
jax: 0.10.0
libtpu: 0.0.40
codegen_flags: <defaults>
</compile_context>

<pallas_src>
import functools

import jax
import jax.numpy as jnp
from jax.experimental import pallas as pl
from jax.experimental.pallas import tpu as pltpu

BN_EPS = 1e-5
NEG_BIG = -1e9                    # bias on padded class lanes; exp() underflows to 0
H1, H2, H3, NC = 512, 256, 128, 128   # hidden dims 500/250/100/2 padded lane-friendly


def _round_up(n, m):
    return ((n + m - 1) // m) * m


def _pad2(a, rows, cols):
    return jnp.pad(a, ((0, rows - a.shape[0]), (0, cols - a.shape[1])))


def _choose_batch_tile(B, *, max_tile=1024, min_steps=2):
    """Batch tile: multiple of 16 (bf16 vreg rows), minimal padding, and an
    even grid of >= min_steps steps when possible so v7x's 2 TCs share work."""
    bp16 = _round_up(max(B, 1), 16)
    steps = pl.cdiv(bp16, max_tile)
    if bp16 >= min_steps * 16:
        steps = max(steps, min_steps)
    if steps > 1 and steps % 2:
        steps += 1                       # even split across the two TensorCores
    bt = _round_up(pl.cdiv(bp16, steps), 16)
    bp = bt * steps
    return bt, bp


def mlp_kernel(x_ref, w1_ref, w2_ref, w3_ref, w4_ref, b_ref, out_ref, *, num_classes):
    x = x_ref[...]                       # (bt, in_pad) bf16
    b = b_ref[...]                       # (4, 512) f32 packed biases

    # fc1 -> relu  (dropout == identity in eval mode)
    h = jnp.dot(x, w1_ref[...], preferred_element_type=jnp.float32) + b[0:1, :]
    h = jnp.maximum(h, 0.0)

    # bn1 folded into fc2' -> relu
    h = jnp.dot(h.astype(jnp.bfloat16), w2_ref[...],
                preferred_element_type=jnp.float32) + b[1:2, :H2]
    h = jnp.maximum(h, 0.0)

    # bn2 folded into fc3' -> relu
    h = jnp.dot(h.astype(jnp.bfloat16), w3_ref[...],
                preferred_element_type=jnp.float32) + b[2:3, :H3]
    h = jnp.maximum(h, 0.0)

    # bn3 folded into fc4' -> log_softmax over the 128 output lanes
    # (padded class lanes carry bias -1e9 so they contribute exp() == 0)
    logits = jnp.dot(h.astype(jnp.bfloat16), w4_ref[...],
                     preferred_element_type=jnp.float32) + b[3:4, :NC]
    m = jnp.max(logits, axis=1, keepdims=True)
    lse = jnp.log(jnp.sum(jnp.exp(logits - m), axis=1, keepdims=True)) + m
    logp = logits - lse
    # mask pad class lanes to 0 before the (possibly bf16) store so the huge
    # pad bias never reaches HBM; keeps the 128-lane unmasked-vst writeback
    lane = jax.lax.broadcasted_iota(jnp.int32, logp.shape, 1)
    out_ref[...] = jnp.where(lane < num_classes, logp, 0.0).astype(out_ref.dtype)


def pack_params(params, inp_dim):
    """Fold eval-mode BatchNorm into the next Linear, zero-pad to MXU-friendly
    shapes, cast weights to bf16 and pack all biases into one (4, 512) array."""
    (w1, b1, g1, be1, rm1, rv1,
     w2, b2, g2, be2, rm2, rv2,
     w3, b3, g3, be3, rm3, rv3,
     w4, b4) = params

    def fold(g, be, rm, rv, w, b):
        scale = g / jnp.sqrt(rv + BN_EPS)          # (1, d_prev)
        shift = be - rm * scale                    # (1, d_prev)
        return scale.reshape(-1, 1) * w, shift @ w + b

    w2f, b2f = fold(g1, be1, rm1, rv1, w2, b2)     # bn1 -> fc2
    w3f, b3f = fold(g2, be2, rm2, rv2, w3, b3)     # bn2 -> fc3
    w4f, b4f = fold(g3, be3, rm3, rv3, w4, b4)     # bn3 -> fc4

    # fc1 contraction dim: pad only to the bf16 sublane quantum, NOT to 128
    in_pad = max(16, _round_up(inp_dim, 16))

    w1p = _pad2(w1, in_pad, H1).astype(jnp.bfloat16)
    w2p = _pad2(w2f, H1, H2).astype(jnp.bfloat16)
    w3p = _pad2(w3f, H2, H3).astype(jnp.bfloat16)
    w4p = _pad2(w4f, H3, NC).astype(jnp.bfloat16)

    bias_pack = jnp.zeros((4, H1), jnp.float32)
    bias_pack = bias_pack.at[0, :b1.shape[1]].set(b1[0])
    bias_pack = bias_pack.at[1, :b2f.shape[1]].set(b2f[0])
    bias_pack = bias_pack.at[2, :b3f.shape[1]].set(b3f[0])
    bias_pack = bias_pack.at[3, :].set(NEG_BIG)
    bias_pack = bias_pack.at[3, :b4f.shape[1]].set(b4f[0])

    return w1p, w2p, w3p, w4p, bias_pack, in_pad


def net_forward(x, packed, *, num_classes=2, max_batch_tile=1024,
                out_dtype=jnp.bfloat16):
    """x: (B, 1, inp_dim) or (B, inp_dim).  Returns (B, num_classes) log-probs."""
    w1p, w2p, w3p, w4p, bias_pack, in_pad = packed
    B = x.shape[0]
    # torch's x.squeeze().float() — done safely (keeps batch axis even for B==1)
    x2 = x.reshape(B, -1).astype(jnp.float32)
    D = x2.shape[1]
    assert D <= in_pad, "input feature dim larger than packed weights"

    bt, bp = _choose_batch_tile(B, max_tile=max_batch_tile)
    xp = jnp.pad(x2, ((0, bp - B), (0, in_pad - D))).astype(jnp.bfloat16)

    out_isz = jnp.dtype(out_dtype).itemsize
    flops = 2 * bp * (in_pad * H1 + H1 * H2 + H2 * H3 + H3 * NC)
    bytes_acc = (2 * (w1p.size + w2p.size + w3p.size + w4p.size)   # bf16 weights
                 + 4 * bias_pack.size + 2 * xp.size + out_isz * bp * NC)

    # explicit VMEM budget: double-buffered weights/bias/x/out + f32 intermediates
    vmem_need = (4 * (w1p.size + w2p.size + w3p.size + w4p.size)
                 + 8 * bias_pack.size
                 + 4 * bt * in_pad
                 + 2 * out_isz * bt * NC
                 + 4 * bt * (H1 + H2 + H3 + 2 * NC))
    vmem_limit = int(min(100 * 2**20, max(24 * 2**20, 2 * vmem_need)))

    resident = lambda i: (0, 0)   # constant index map -> weights stay VMEM-resident
    out = pl.pallas_call(
        functools.partial(mlp_kernel, num_classes=num_classes),
        out_shape=jax.ShapeDtypeStruct((bp, NC), out_dtype),
        grid_spec=pltpu.PrefetchScalarGridSpec(
            num_scalar_prefetch=0,
            grid=(bp // bt,),
            in_specs=[
                pl.BlockSpec((bt, in_pad), lambda i: (i, 0)),
                pl.BlockSpec((in_pad, H1), resident),
                pl.BlockSpec((H1, H2), resident),
                pl.BlockSpec((H2, H3), resident),
                pl.BlockSpec((H3, NC), resident),
                pl.BlockSpec((4, H1), resident),
            ],
            out_specs=pl.BlockSpec((bt, NC), lambda i: (i, 0)),
        ),
        compiler_params=pltpu.CompilerParams(
            dimension_semantics=("parallel",),
            vmem_limit_bytes=vmem_limit),
        cost_estimate=pl.CostEstimate(
            flops=flops, transcendentals=bp * NC, bytes_accessed=bytes_acc),
    )(xp, w1p, w2p, w3p, w4p, bias_pack)

    return out[:B, :num_classes]


def init_params(key, inp_dim):
    """Deterministic parameter init matching the shapes of Net.__init__."""
    dims = [(inp_dim, 500), (500, 250), (250, 100), (100, 2)]
    keys = jax.random.split(key, 16)
    params = []
    ki = 0
    for idx, (din, dout) in enumerate(dims):
        bound = 1.0 / (din ** 0.5)
        w = jax.random.uniform(keys[ki], (din, dout), jnp.float32, -bound, bound); ki += 1
        b = jax.random.uniform(keys[ki], (1, dout), jnp.float32, -bound, bound); ki += 1
        params += [w, b]
        if idx < 3:  # bn1 / bn2 / bn3 (after fc1, fc2, fc3)
            gamma = 1.0 + 0.1 * jax.random.normal(keys[ki], (1, dout), jnp.float32); ki += 1
            beta = 0.1 * jax.random.normal(keys[ki], (1, dout), jnp.float32); ki += 1
            rmean = 0.05 * jnp.arange(dout, dtype=jnp.float32).reshape(1, dout) / dout
            rvar = 1.0 + 0.02 * jnp.arange(dout, dtype=jnp.float32).reshape(1, dout) / dout
            params += [gamma, beta, rmean, rvar]
    return params


def reference_forward(x, params):
    """Pure f32 JAX reference with original (unfused) eval-mode semantics."""
    x = x.reshape(x.shape[0], -1).astype(jnp.float32)
    (w1, b1, g1, be1, rm1, rv1,
     w2, b2, g2, be2, rm2, rv2,
     w3, b3, g3, be3, rm3, rv3,
     w4, b4) = params
    h = jnp.maximum(x @ w1 + b1, 0.0)
    h = (h - rm1) * (g1 / jnp.sqrt(rv1 + BN_EPS)) + be1
    h = jnp.maximum(h @ w2 + b2, 0.0)
    h = (h - rm2) * (g2 / jnp.sqrt(rv2 + BN_EPS)) + be2
    h = jnp.maximum(h @ w3 + b3, 0.0)
    h = (h - rm3) * (g3 / jnp.sqrt(rv3 + BN_EPS)) + be3
    logits = h @ w4 + b4
    return jax.nn.log_softmax(logits, axis=1)


if __name__ == "__main__":
    key = jax.random.PRNGKey(0)
    k_x, k_p = jax.random.split(key)

    INP_DIM = 32
    BATCH = 8
    # torch DataLoader often yields (B, 1, D); forward squeezes it to (B, D).
    x = jax.random.normal(k_x, (BATCH, 1, INP_DIM), dtype=jnp.float32)

    params = init_params(k_p, INP_DIM)
    packed = pack_params(params, INP_DIM)

    # reuse one compiled executable across calls (weights stay device-resident)
    fwd = jax.jit(lambda xx: net_forward(xx, packed))
    out = jax.block_until_ready(fwd(x))

    ref = reference_forward(x, params)
    assert out.shape == (BATCH, 2)
    out_f32 = out.astype(jnp.float32)
    max_err = float(jnp.max(jnp.abs(out_f32 - ref)))
    # bf16 weights/activations/output vs f32 reference -> loose tolerance
    assert jnp.allclose(out_f32, ref, atol=3e-2, rtol=3e-2), (
        f"mismatch vs JAX reference (max abs err {max_err})")

    print("KERNEL_OK")
</pallas_src>

<mosaic_0001>
module attributes {stable_mosaic.version = 11 : i64} {
  func.func @mlp_kernel(%arg0: i32, %arg1: memref<16x32xbf16, #tpu.memory_space<vmem>>, %arg2: memref<32x512xbf16, #tpu.memory_space<vmem>>, %arg3: memref<512x256xbf16, #tpu.memory_space<vmem>>, %arg4: memref<256x128xbf16, #tpu.memory_space<vmem>>, %arg5: memref<128x128xbf16, #tpu.memory_space<vmem>>, %arg6: memref<4x512xf32, #tpu.memory_space<vmem>>, %arg7: memref<16x128xbf16, #tpu.memory_space<vmem>>) attributes {dimension_semantics = [#tpu.dimension_semantics<parallel>], iteration_bounds = array<i64: 1>, scalar_prefetch = 0 : i64, scratch_operands = 0 : i64, tpu.core_type = #tpu.core_type<tc>, window_params = [{transform_indices = @transform_0, window_bounds = array<i64: 16, 32>}, {pipeline_mode = #tpu.pipeline_mode<synchronous>, transform_indices = @transform_1, window_bounds = array<i64: 32, 512>}, {pipeline_mode = #tpu.pipeline_mode<synchronous>, transform_indices = @transform_2, window_bounds = array<i64: 512, 256>}, {pipeline_mode = #tpu.pipeline_mode<synchronous>, transform_indices = @transform_3, window_bounds = array<i64: 256, 128>}, {pipeline_mode = #tpu.pipeline_mode<synchronous>, transform_indices = @transform_4, window_bounds = array<i64: 128, 128>}, {pipeline_mode = #tpu.pipeline_mode<synchronous>, transform_indices = @transform_5, window_bounds = array<i64: 4, 512>}, {transform_indices = @transform_6, window_bounds = array<i64: 16, 128>}]} {
    %c0 = arith.constant 0 : index
    %c0_0 = arith.constant 0 : index
    %0 = vector.load %arg1[%c0, %c0_0] : memref<16x32xbf16, #tpu.memory_space<vmem>>, vector<16x32xbf16>
    %c0_1 = arith.constant 0 : index
    %c0_2 = arith.constant 0 : index
    %1 = vector.load %arg6[%c0_1, %c0_2] : memref<4x512xf32, #tpu.memory_space<vmem>>, vector<4x512xf32>
    %c0_3 = arith.constant 0 : index
    %c0_4 = arith.constant 0 : index
    %2 = vector.load %arg2[%c0_3, %c0_4] : memref<32x512xbf16, #tpu.memory_space<vmem>>, vector<32x512xbf16>
    %cst = arith.constant dense<0.000000e+00> : vector<16x512xf32>
    %3 = tpu.matmul %0, %2, %cst {dimension_numbers = #tpu.dot_dimension_numbers<[1], [0], [0], [1], [0, 0, 1, 1], [], []>} : vector<16x32xbf16>, vector<32x512xbf16>, vector<16x512xf32> -> vector<16x512xf32>
    %4 = vector.extract_strided_slice %1 {offsets = [0, 0], sizes = [1, 512], strides = [1, 1]} : vector<4x512xf32> to vector<1x512xf32>
    %5 = vector.broadcast %4 : vector<1x512xf32> to vector<16x512xf32>
    %6 = arith.addf %3, %5 : vector<16x512xf32>
    %cst_5 = arith.constant 0.000000e+00 : f32
    %7 = vector.broadcast %cst_5 : f32 to vector<16x512xf32>
    %8 = arith.maximumf %6, %7 : vector<16x512xf32>
    %9 = arith.truncf %8 : vector<16x512xf32> to vector<16x512xbf16>
    %c0_6 = arith.constant 0 : index
    %c0_7 = arith.constant 0 : index
    %10 = vector.load %arg3[%c0_6, %c0_7] : memref<512x256xbf16, #tpu.memory_space<vmem>>, vector<512x256xbf16>
    %cst_8 = arith.constant dense<0.000000e+00> : vector<16x256xf32>
    %11 = tpu.matmul %9, %10, %cst_8 {dimension_numbers = #tpu.dot_dimension_numbers<[1], [0], [0], [1], [0, 0, 1, 1], [], []>} : vector<16x512xbf16>, vector<512x256xbf16>, vector<16x256xf32> -> vector<16x256xf32>
    %12 = vector.extract_strided_slice %1 {offsets = [1, 0], sizes = [1, 256], strides = [1, 1]} : vector<4x512xf32> to vector<1x256xf32>
    %13 = vector.broadcast %12 : vector<1x256xf32> to vector<16x256xf32>
    %14 = arith.addf %11, %13 : vector<16x256xf32>
    %cst_9 = arith.constant 0.000000e+00 : f32
    %15 = vector.broadcast %cst_9 : f32 to vector<16x256xf32>
    %16 = arith.maximumf %14, %15 : vector<16x256xf32>
    %17 = arith.truncf %16 : vector<16x256xf32> to vector<16x256xbf16>
    %c0_10 = arith.constant 0 : index
    %c0_11 = arith.constant 0 : index
    %18 = vector.load %arg4[%c0_10, %c0_11] : memref<256x128xbf16, #tpu.memory_space<vmem>>, vector<256x128xbf16>
    %cst_12 = arith.constant dense<0.000000e+00> : vector<16x128xf32>
    %19 = tpu.matmul %17, %18, %cst_12 {dimension_numbers = #tpu.dot_dimension_numbers<[1], [0], [0], [1], [0, 0, 1, 1], [], []>} : vector<16x256xbf16>, vector<256x128xbf16>, vector<16x128xf32> -> vector<16x128xf32>
    %20 = vector.extract_strided_slice %1 {offsets = [2, 0], sizes = [1, 128], strides = [1, 1]} : vector<4x512xf32> to vector<1x128xf32>
    %21 = vector.broadcast %20 : vector<1x128xf32> to vector<16x128xf32>
    %22 = arith.addf %19, %21 : vector<16x128xf32>
    %cst_13 = arith.constant 0.000000e+00 : f32
    %23 = vector.broadcast %cst_13 : f32 to vector<16x128xf32>
    %24 = arith.maximumf %22, %23 : vector<16x128xf32>
    %25 = arith.truncf %24 : vector<16x128xf32> to vector<16x128xbf16>
    %c0_14 = arith.constant 0 : index
    %c0_15 = arith.constant 0 : index
    %26 = vector.load %arg5[%c0_14, %c0_15] : memref<128x128xbf16, #tpu.memory_space<vmem>>, vector<128x128xbf16>
    %cst_16 = arith.constant dense<0.000000e+00> : vector<16x128xf32>
    %27 = tpu.matmul %25, %26, %cst_16 {dimension_numbers = #tpu.dot_dimension_numbers<[1], [0], [0], [1], [0, 0, 1, 1], [], []>} : vector<16x128xbf16>, vector<128x128xbf16>, vector<16x128xf32> -> vector<16x128xf32>
    %28 = vector.extract_strided_slice %1 {offsets = [3, 0], sizes = [1, 128], strides = [1, 1]} : vector<4x512xf32> to vector<1x128xf32>
    %29 = vector.broadcast %28 : vector<1x128xf32> to vector<16x128xf32>
    %30 = arith.addf %27, %29 : vector<16x128xf32>
    %cst_17 = arith.constant dense<0xFF800000> : vector<16xf32>
    %31 = vector.multi_reduction <maximumf>, %30, %cst_17 [1] : vector<16x128xf32> to vector<16xf32>
    %32 = vector.shape_cast %31 : vector<16xf32> to vector<16x1xf32>
    %33 = vector.broadcast %32 : vector<16x1xf32> to vector<16x128xf32>
    %34 = arith.subf %30, %33 : vector<16x128xf32>
    %35 = math.exp %34 : vector<16x128xf32>
    %cst_18 = arith.constant dense<0.000000e+00> : vector<16xf32>
    %36 = vector.multi_reduction <add>, %35, %cst_18 [1] : vector<16x128xf32> to vector<16xf32>
    %37 = vector.shape_cast %36 : vector<16xf32> to vector<16x1xf32>
    %38 = math.log %37 : vector<16x1xf32>
    %39 = arith.addf %38, %32 : vector<16x1xf32>
    %40 = vector.broadcast %39 : vector<16x1xf32> to vector<16x128xf32>
    %41 = arith.subf %30, %40 : vector<16x128xf32>
    %42 = tpu.iota {dimensions = array<i32: 1>} : vector<16x128xi32>
    %c2_i32 = arith.constant 2 : i32
    %43 = vector.broadcast %c2_i32 : i32 to vector<16x128xi32>
    %44 = arith.cmpi slt, %42, %43 : vector<16x128xi32>
    %cst_19 = arith.constant 0.000000e+00 : f32
    %45 = vector.broadcast %cst_19 : f32 to vector<16x128xf32>
    %46 = arith.select %44, %41, %45 : vector<16x128xi1>, vector<16x128xf32>
    %47 = arith.truncf %46 : vector<16x128xf32> to vector<16x128xbf16>
    %c0_20 = arith.constant 0 : index
    %c0_21 = arith.constant 0 : index
    %48 = vector.load %arg7[%c0_20, %c0_21] : memref<16x128xbf16, #tpu.memory_space<vmem>>, vector<16x128xbf16>
    tpu.vector_store %arg7[%c0_20, %c0_21], %47 {strides = array<i32>} : memref<16x128xbf16, #tpu.memory_space<vmem>>, vector<16x128xbf16>,
    return
  }
  func.func @transform_0(%arg0: i32) -> (i32, i32) {
    %c0_i32 = arith.constant 0 : i32
    %c0_i32_0 = arith.constant 0 : i32
    return %arg0, %c0_i32 : i32, i32
  }
  func.func @transform_1(%arg0: i32) -> (i32, i32) {
    %c0_i32 = arith.constant 0 : i32
    %c0_i32_0 = arith.constant 0 : i32
    %c0_i32_1 = arith.constant 0 : i32
    return %c0_i32, %c0_i32_0 : i32, i32
  }
  func.func @transform_2(%arg0: i32) -> (i32, i32) {
    %c0_i32 = arith.constant 0 : i32
    %c0_i32_0 = arith.constant 0 : i32
    %c0_i32_1 = arith.constant 0 : i32
    return %c0_i32, %c0_i32_0 : i32, i32
  }
  func.func @transform_3(%arg0: i32) -> (i32, i32) {
    %c0_i32 = arith.constant 0 : i32
    %c0_i32_0 = arith.constant 0 : i32
    %c0_i32_1 = arith.constant 0 : i32
    return %c0_i32, %c0_i32_0 : i32, i32
  }
  func.func @transform_4(%arg0: i32) -> (i32, i32) {
    %c0_i32 = arith.constant 0 : i32
    %c0_i32_0 = arith.constant 0 : i32
    %c0_i32_1 = arith.constant 0 : i32
    return %c0_i32, %c0_i32_0 : i32, i32
  }
  func.func @transform_5(%arg0: i32) -> (i32, i32) {
    %c0_i32 = arith.constant 0 : i32
    %c0_i32_0 = arith.constant 0 : i32
    %c0_i32_1 = arith.constant 0 : i32
    return %c0_i32, %c0_i32_0 : i32, i32
  }
  func.func @transform_6(%arg0: i32) -> (i32, i32) {
    %c0_i32 = arith.constant 0 : i32
    %c0_i32_0 = arith.constant 0 : i32
    return %arg0, %c0_i32 : i32, i32
  }
}

</mosaic_0001>

<bundles_post_ra>
// kernel: _lambda_.1
= control target key start
LH: loop header
LB: loop body
LE: loop exit
PB: predicated region body
PF: predicated region fallthrough
CT: control target
= control target key end

     0   :  { %v1352_v1 = vmov 0   ;;  %vm119_vm0 = vcmask 261120   ;;  %v38_v54 = vlaneseq  ;;  %vm1354_vm1 = vmmov 0   ;;  %s1710_s1 = inlined_call_operand.vmem [shape: bf16[32,512], index: 1, kind: input, shape index: {}]   ;;  %s1711_s0 = inlined_call_operand.vmem [shape: bf16[16,32], index: 0, kind: input, shape index: {}]   ;;  %s1712_s2 = inlined_call_operand.vmem [shape: bf16[512,256], index: 2, kind: input, shape index: {}]   ;;  %s1713_s3 = inlined_call_operand.vmem [shape: bf16[256,128], index: 3, kind: input, shape index: {}]   ;;  %s1714_s5 = inlined_call_operand.vmem [shape: f32[4,512], index: 5, kind: input, shape index: {}]   ;;  %s1715_s4 = inlined_call_operand.vmem [shape: bf16[128,128], index: 4, kind: input, shape index: {}]   ;;  %s1716_s6 = inlined_call_operand.vmem [shape: bf16[16,128], index: 6, kind: output, shape index: {}]  }
   0x1   :  { %v1211_v0 = vld [vmem:[%s1710_s1 + $0x4] ss:$16 sps:$4 sm:$0xff]   ;;  %155 = vmatprep.mubr.bf16.mxu1 %v1352_v1  ;;  %v1213_v2 = vld [vmem:[%s1710_s1] ss:$16 sps:$4 sm:$0xff]   ;;  %v1220_v5 = vld [vmem:[%s1710_s1 + $0xc] ss:$16 sps:$4 sm:$0xff]  }
   0x2   :  { %123 = vmatprep.subr.bf16.mxu1 %v1211_v0  ;;  %v1214_v3 = vld [vmem:[%s1710_s1 + $0x24] ss:$16 sps:$4 sm:$0xff]   ;;  %v1216_v4 = vld [vmem:[%s1710_s1 + $0x20] ss:$16 sps:$4 sm:$0xff]   ;;  %v1218_v7 = vld [vmem:[%s1710_s1 + $0x8] ss:$16 sps:$4 sm:$0xff]  }
   0x3   :  { %124 = vmatpush1.bf16.msra.mxu1 %v1213_v2  ;;  %v1217_v6 = vld [vmem:[%s1711_s0] sm:$0xff]   ;;  %v1223_v10 = vld [vmem:[%s1710_s1 + $0x2c] ss:$16 sps:$4 sm:$0xff]   ;;  %v1229_v12 = vld [vmem:[%s1712_s2 + $0x10] ss:$8 sps:$4 sm:$0xff]   ;;  %v1552_v55 = vshrl.u32 %v38_v54, 7 }
   0x4   :  { %125 = vmatprep.subr.bf16.mxu1 %v1214_v3  ;;  %v1224_v8 = vld [vmem:[%s1712_s2 + $0x4] ss:$8 sps:$4 sm:$0xff]   ;;  %v1226_v9 = vld [vmem:[%s1712_s2] ss:$8 sps:$4 sm:$0xff]   ;;  %v1227_v11 = vld [vmem:[%s1712_s2 + $0x14] ss:$8 sps:$4 sm:$0xff]  }
   0x5   :  { %623 = vmatprep.subr.bf16.mxu0 %v1224_v8  ;;  %v1221_v13 = vld [vmem:[%s1710_s1 + $0x28] ss:$16 sps:$4 sm:$0xff]   ;;  %v1230_v14 = vld [vmem:[%s1712_s2 + $0x24] ss:$8 sps:$4 sm:$0xff]   ;;  %v1233_v16 = vld [vmem:[%s1712_s2 + $0x34] ss:$8 sps:$4 sm:$0xff]  }
   0x6   :  { %624 = vmatpush1.bf16.msra.mxu0 %v1226_v9  ;;  %v1232_v15 = vld [vmem:[%s1712_s2 + $0x20] ss:$8 sps:$4 sm:$0xff]   ;;  %v1235_v17 = vld [vmem:[%s1712_s2 + $0x30] ss:$8 sps:$4 sm:$0xff]   ;;  %v1236_v18 = vld [vmem:[%s1712_s2 + $0x44] ss:$8 sps:$4 sm:$0xff]  }
   0x7   :  { %126 = vmatpush1.bf16.msra.mxu1 %v1216_v4  ;;  %625 = vmatprep.subr.bf16.mxu0 %v1227_v11  ;;  %v1238_v19 = vld [vmem:[%s1712_s2 + $0x40] ss:$8 sps:$4 sm:$0xff]   ;;  %v1239_v20 = vld [vmem:[%s1712_s2 + $0x54] ss:$8 sps:$4 sm:$0xff]   ;;  %v1241_v21 = vld [vmem:[%s1712_s2 + $0x50] ss:$8 sps:$4 sm:$0xff]  }
   0x8   :  { %166 = vmatprep.subr.bf16.mxu1 %v1220_v5  ;;  %v1242_v22 = vld [vmem:[%s1712_s2 + $0x64] ss:$8 sps:$4 sm:$0xff]   ;;  %v1244_v23 = vld [vmem:[%s1712_s2 + $0x60] ss:$8 sps:$4 sm:$0xff]   ;;  %v1245_v24 = vld [vmem:[%s1712_s2 + $0x74] ss:$8 sps:$4 sm:$0xff]  }
   0x9   :  { %v1247_v25 = vld [vmem:[%s1712_s2 + $0x70] ss:$8 sps:$4 sm:$0xff]   ;;  %v1248_v26 = vld [vmem:[%s1712_s2 + $0x84] ss:$8 sps:$4 sm:$0xff]   ;;  %v1250_v27 = vld [vmem:[%s1712_s2 + $0x80] ss:$8 sps:$4 sm:$0xff]  }
   0xa   :  { %1050 = vmatmul.mubr.msk.bf16.vlgmr.msra.gmra.mrb[0].mxu1 %vm119_vm0, %v1217_v6  ;;  %626 = vmatpush1.bf16.msra.mxu0 %v1229_v12  ;;  %v1251_v28 = vld [vmem:[%s1712_s2 + $0x94] ss:$8 sps:$4 sm:$0xff]   ;;  %v1253_v29 = vld [vmem:[%s1712_s2 + $0x90] ss:$8 sps:$4 sm:$0xff]   ;;  %v1254_v30 = vld [vmem:[%s1712_s2 + $0xa4] ss:$8 sps:$4 sm:$0xff]  }
   0xb   :  { %167 = vmatpush1.bf16.msra.mxu1 %v1218_v7  ;;  %198 = vmatprep.mubr.bf16.mxu1 %v1352_v1  ;;  %v1256_v31 = vld [vmem:[%s1712_s2 + $0xa0] ss:$8 sps:$4 sm:$0xff]   ;;  %v1257_v32 = vld [vmem:[%s1712_s2 + $0xb4] ss:$8 sps:$4 sm:$0xff]   ;;  %v1259_v33 = vld [vmem:[%s1712_s2 + $0xb0] ss:$8 sps:$4 sm:$0xff]  }
   0xc   :  { %168 = vmatprep.subr.bf16.mxu1 %v1223_v10  ;;  %627 = vmatprep.subr.bf16.mxu0 %v1230_v14  ;;  %v1260_v34 = vld [vmem:[%s1712_s2 + $0xc4] ss:$8 sps:$4 sm:$0xff]   ;;  %v1262_v35 = vld [vmem:[%s1712_s2 + $0xc0] ss:$8 sps:$4 sm:$0xff]   ;;  %v1263_v36 = vld [vmem:[%s1712_s2 + $0xd4] ss:$8 sps:$4 sm:$0xff]  }
   0xd   :  { %v1265_v37 = vld [vmem:[%s1712_s2 + $0xd0] ss:$8 sps:$4 sm:$0xff]   ;;  %v1266_v38 = vld [vmem:[%s1712_s2 + $0xe4] ss:$8 sps:$4 sm:$0xff]   ;;  %v1268_v39 = vld [vmem:[%s1712_s2 + $0xe0] ss:$8 sps:$4 sm:$0xff]  }
   0xe   :  { %628 = vmatpush1.bf16.msra.mxu0 %v1232_v15  ;;  %v1269_v40 = vld [vmem:[%s1712_s2 + $0xf4] ss:$8 sps:$4 sm:$0xff]   ;;  %v1271_v41 = vld [vmem:[%s1712_s2 + $0xf0] ss:$8 sps:$4 sm:$0xff]   ;;  %v1274_v42 = vld [vmem:[%s1712_s2 + $0x104] ss:$8 sps:$4 sm:$0xff]  }
   0xf   :  { %169 = vmatpush1.bf16.msra.mxu1 %v1221_v13  ;;  %629 = vmatprep.subr.bf16.mxu0 %v1233_v16  ;;  %v1320_v43 = vld [vmem:[%s1713_s3 + $0x40] sm:$0xff]   ;;  %v1322_v45 = vld [vmem:[%s1713_s3 + $0x48] sm:$0xff]   ;;  %v1324_v47 = vld [vmem:[%s1713_s3 + $0x50] sm:$0xff]   ;;  %v40_v56 = vsub.s32 0, %v1552_v55  ;;  %v44_v58 = vsub.s32 4, %v1552_v55 }
  0x10   :  { %v1321_v44 = vld [vmem:[%s1713_s3] sm:$0xff]   ;;  %1149 = vmatprep.subr.bf16.mxu1 %v1320_v43  ;;  %v1323_v46 = vld [vmem:[%s1713_s3 + $0x8] sm:$0xff]   ;;  %v1325_v48 = vld [vmem:[%s1713_s3 + $0x10] sm:$0xff]  }
  0x11   :  { %v1326_v49 = vld [vmem:[%s1713_s3 + $0x58] sm:$0xff]   ;;  %v1328_v51 = vld [vmem:[%s1713_s3 + $0x60] sm:$0xff]   ;;  %v1330_v53 = vld [vmem:[%s1713_s3 + $0x68] sm:$0xff]  }
  0x12   :  { %1051 = vmatmul.mubr.msk.bf16.vlgmr.msra.gmra.mrb[4].mxu1 %vm119_vm0, %v1217_v6  ;;  %630 = vmatpush1.bf16.msra.mxu0 %v1235_v17  ;;  %v1327_v50 = vld [vmem:[%s1713_s3 + $0x18] sm:$0xff]   ;;  %v1329_v52 = vld [vmem:[%s1713_s3 + $0x20] sm:$0xff]   ;;  %v27_v63 = vld [vmem:[%s1714_s5 + $0x8] sm:$0xff] }
  0x13   :  { %631 = vmatprep.subr.bf16.mxu0 %v1236_v18  ;;  %1150 = vmatpush3.bf16.msra.mxu1 %v1321_v44  ;;  %v1558_v57 = vld [vmem:[%s1714_s5] sm:$0xff]  ;;  %v49_v3 = vrot.slane %v27_v63, %v40_v56  ;;  %v53_v6 = vrot.slane %v27_v63, %v44_v58 }
  0x14   :  { %1151 = vmatprep.subr.bf16.mxu1 %v1322_v45  ;;  %v41_v59 = vrot.slane %v1558_v57, %v40_v56  ;;  %v45_v60 = vrot.slane %v1558_v57, %v44_v58  ;;  %v1272_v18 = vld [vmem:[%s1712_s2 + $0x100] ss:$8 sps:$4 sm:$0xff]   ;;  %v1292_v43 = vld [vmem:[%s1712_s2 + $0x164] ss:$8 sps:$4 sm:$0xff]   ;;  %v1295_v45 = vld [vmem:[%s1712_s2 + $0x174] ss:$8 sps:$4 sm:$0xff]  }
  0x15   :  { %v69_v12 = vrot.slane %v49_v3, %v40_v56  ;;  %v73_v15 = vrot.slane %v53_v6, %v40_v56  ;;  %v1290_v44 = vld [vmem:[%s1712_s2 + $0x160] ss:$8 sps:$4 sm:$0xff]   ;;  %v1310_v58 = vld [vmem:[%s1712_s2 + $0x1c4] ss:$8 sps:$4 sm:$0xff]   ;;  %v1332_v3 = vld [vmem:[%s1713_s3 + $0x70] sm:$0xff]  }
  0x16   :  { %632 = vmatpush1.bf16.msra.mxu0 %v1238_v19  ;;  %v61_v61 = vrot.slane %v41_v59, %v40_v56  ;;  %v65_v62 = vrot.slane %v45_v60, %v40_v56  ;;  %v1305_v56 = vld [vmem:[%s1712_s2 + $0x1b0] ss:$8 sps:$4 sm:$0xff]   ;;  %v1308_v59 = vld [vmem:[%s1712_s2 + $0x1c0] ss:$8 sps:$4 sm:$0xff]   ;;  %v1313_v60 = vld [vmem:[%s1712_s2 + $0x1d4] ss:$8 sps:$4 sm:$0xff]  }
  0x17   :  { %633 = vmatprep.subr.bf16.mxu0 %v1239_v20  ;;  %1152 = vmatpush3.bf16.msra.mxu1 %v1323_v46  ;;  %v1277_v20 = vld [vmem:[%s1712_s2 + $0x114] ss:$8 sps:$4 sm:$0xff]   ;;  %v1293_v46 = vld [vmem:[%s1712_s2 + $0x170] ss:$8 sps:$4 sm:$0xff]   ;;  %v1314_v63 = vld [vmem:[%s1712_s2 + $0x1e0] ss:$8 sps:$4 sm:$0xff]  }
  0x18   :  { %1153 = vmatprep.subr.bf16.mxu1 %v1324_v47  ;;  %v1298_v47 = vld [vmem:[%s1712_s2 + $0x184] ss:$8 sps:$4 sm:$0xff]   ;;  %v1335_v6 = vld [vmem:[%s1713_s3 + $0x38] sm:$0xff]  }
  0x1a   :  { %634 = vmatpush1.bf16.msra.mxu0 %v1241_v21 }
  0x1b   :  { %635 = vmatprep.subr.bf16.mxu0 %v1242_v22  ;;  %1154 = vmatpush3.bf16.msra.mxu1 %v1325_v48  ;;  %v1296_v48 = vld [vmem:[%s1712_s2 + $0x180] ss:$8 sps:$4 sm:$0xff]  }
  0x1c   :  { %1155 = vmatprep.subr.bf16.mxu1 %v1326_v49  ;;  %v1301_v49 = vld [vmem:[%s1712_s2 + $0x194] ss:$8 sps:$4 sm:$0xff]  }
  0x1e   :  { %636 = vmatpush1.bf16.msra.mxu0 %v1244_v23 }
  0x1f   :  { %637 = vmatprep.subr.bf16.mxu0 %v1245_v24  ;;  %1156 = vmatpush3.bf16.msra.mxu1 %v1327_v50  ;;  %v1299_v50 = vld [vmem:[%s1712_s2 + $0x190] ss:$8 sps:$4 sm:$0xff]  }
  0x20   :  { %1157 = vmatprep.subr.bf16.mxu1 %v1328_v51  ;;  %v1304_v51 = vld [vmem:[%s1712_s2 + $0x1a4] ss:$8 sps:$4 sm:$0xff]  }
  0x22   :  { %638 = vmatpush1.bf16.msra.mxu0 %v1247_v25 }
  0x23   :  { %639 = vmatprep.subr.bf16.mxu0 %v1248_v26  ;;  %1158 = vmatpush3.bf16.msra.mxu1 %v1329_v52  ;;  %v1302_v52 = vld [vmem:[%s1712_s2 + $0x1a0] ss:$8 sps:$4 sm:$0xff]  }
  0x24   :  { %1159 = vmatprep.subr.bf16.mxu1 %v1330_v53  ;;  %v1307_v53 = vld [vmem:[%s1712_s2 + $0x1b4] ss:$8 sps:$4 sm:$0xff]  }
  0x26   :  { %640 = vmatpush1.bf16.msra.mxu0 %v1250_v27 }
  0x27   :  { %641 = vmatprep.subr.bf16.mxu0 %v1251_v28  ;;  %v1275_v28 = vld [vmem:[%s1712_s2 + $0x110] ss:$8 sps:$4 sm:$0xff]  }
  0x2a   :  { %642 = vmatpush1.bf16.msra.mxu0 %v1253_v29 }
  0x2b   :  { %643 = vmatprep.subr.bf16.mxu0 %v1254_v30 }
  0x2e   :  { %644 = vmatpush1.bf16.msra.mxu0 %v1256_v31  ;;  %v1280_v31 = vld [vmem:[%s1712_s2 + $0x124] ss:$8 sps:$4 sm:$0xff]  }
  0x2f   :  { %645 = vmatprep.subr.bf16.mxu0 %v1257_v32 }
  0x32   :  { %646 = vmatpush1.bf16.msra.mxu0 %v1259_v33 }
  0x33   :  { %647 = vmatprep.subr.bf16.mxu0 %v1260_v34 }
  0x36   :  { %648 = vmatpush1.bf16.msra.mxu0 %v1262_v35  ;;  %v1278_v35 = vld [vmem:[%s1712_s2 + $0x120] ss:$8 sps:$4 sm:$0xff]  }
  0x37   :  { %649 = vmatprep.subr.bf16.mxu0 %v1263_v36 }
  0x3a   :  { %650 = vmatpush1.bf16.msra.mxu0 %v1265_v37  ;;  %v1283_v37 = vld [vmem:[%s1712_s2 + $0x134] ss:$8 sps:$4 sm:$0xff]  }
  0x3b   :  { %651 = vmatprep.subr.bf16.mxu0 %v1266_v38  ;;  %v1281_v38 = vld [vmem:[%s1712_s2 + $0x130] ss:$8 sps:$4 sm:$0xff]  }
  0x3e   :  { %652 = vmatpush1.bf16.msra.mxu0 %v1268_v39  ;;  %v1286_v39 = vld [vmem:[%s1712_s2 + $0x144] ss:$8 sps:$4 sm:$0xff]  }
  0x3f   :  { %653 = vmatprep.subr.bf16.mxu0 %v1269_v40  ;;  %v1284_v40 = vld [vmem:[%s1712_s2 + $0x140] ss:$8 sps:$4 sm:$0xff]  }
  0x42   :  { %654 = vmatpush1.bf16.msra.mxu0 %v1271_v41  ;;  %v1289_v41 = vld [vmem:[%s1712_s2 + $0x154] ss:$8 sps:$4 sm:$0xff]  }
  0x43   :  { %666 = vmatprep.subr.bf16.mxu0 %v1274_v42  ;;  %v1287_v42 = vld [vmem:[%s1712_s2 + $0x150] ss:$8 sps:$4 sm:$0xff]  }
  0xdd   :  { %v157_v0 = vpop.f32.mrb[0].mxu1 }
  0xde   :  { %v158_v1 = vadd.f32 %v157_v0, %v61_v61  ;;  %v159_v2 = vpop.f32.mrb[1].mxu1  ;;  %v1319_v0 = vld [vmem:[%s1712_s2 + $0x1f4] ss:$8 sps:$4 sm:$0xff]  }
  0xdf   :  { %v160_v4 = vadd.f32 %v159_v2, %v65_v62  ;;  %v161_v5 = vpop.f32.mrb[2].mxu1  ;;  %v1331_v2 = vld [vmem:[%s1713_s3 + $0x28] sm:$0xff]  }
  0xe0   :  { %v162_v7 = vadd.f32 %v161_v5, %v61_v61  ;;  %v163_v8 = vpop.f32.mrb[3].mxu1  ;;  %v209_v10 = vmax.f32 %v158_v1, 0.0  ;;  %v1311_v61 = vld [vmem:[%s1712_s2 + $0x1d0] ss:$8 sps:$4 sm:$0xff]   ;;  %1160 = vmatpush3.bf16.msra.mxu1 %v1331_v2 }
  0xe1   :  { %v164_v9 = vadd.f32 %v163_v8, %v65_v62  ;;  %v210_v13 = vmax.f32 %v160_v4, 0.0  ;;  %v1316_v62 = vld [vmem:[%s1712_s2 + $0x1e4] ss:$8 sps:$4 sm:$0xff]   ;;  %v1317_v1 = vld [vmem:[%s1712_s2 + $0x1f0] ss:$8 sps:$4 sm:$0xff]   ;;  %1161 = vmatprep.subr.bf16.mxu1 %v1332_v3  ;;  %v287_v8 = vsub.s32 1, %v1552_v55 }
  0xe2   :  { %v213_v11 = vmax.f32 %v162_v7, 0.0  ;;  %v1333_v4 = vld [vmem:[%s1713_s3 + $0x30] sm:$0xff]   ;;  %v1334_v5 = vld [vmem:[%s1713_s3 + $0x78] sm:$0xff]   ;;  %v1353_v7 = vmov 0.0  }
  0xe3   :  { %v214_v14 = vmax.f32 %v164_v9, 0.0  ;;  %v291_v9 = vsub.s32 5, %v1552_v55 }
  0xe4   :  { %v217_v16 = vpack.c.bf16 %v213_v11, %v209_v10  ;;  %1162 = vmatpush3.bf16.msra.mxu1 %v1333_v4  ;;  %v288_v10 = vrot.slane %v1558_v57, %v287_v8 }
  0xe5   :  { %v218_v17 = vpack.c.bf16 %v214_v14, %v210_v13  ;;  %v200_v19 = vpop.f32.mrb[4].mxu1  ;;  %1163 = vmatprep.subr.bf16.mxu1 %v1334_v5  ;;  %v292_v11 = vrot.slane %v1558_v57, %v291_v9 }
  0xe6   :  { %v201_v21 = vadd.f32 %v200_v19, %v69_v12  ;;  %v202_v22 = vpop.f32.mrb[5].mxu1 }
  0xe7   :  { %655 = vmatprep.mubr.bf16.mxu0 %v218_v17  ;;  %v203_v23 = vadd.f32 %v202_v22, %v73_v15  ;;  %v204_v24 = vpop.f32.mrb[6].mxu1  ;;  %v302_v13 = vrot.slane %v292_v11, %v287_v8 }
  0xe8   :  { %656 = vmatmul.mubr.bf16.vlgmr.msra.gmra.mrb[0].mxu0 %v217_v16  ;;  %v211_v25 = vmax.f32 %v201_v21, 0.0  ;;  %v205_v26 = vadd.f32 %v204_v24, %v69_v12  ;;  %v206_v27 = vpop.f32.mrb[7].mxu1  ;;  %1164 = vmatpush3.bf16.msra.mxu1 %v1335_v6  ;;  %v298_v12 = vrot.slane %v288_v10, %v287_v8  ;;  %v1023_v8 = vand.u32 127, %v38_v54 }
  0xe9   :  { %667 = vmatpush1.bf16.msra.mxu0 %v1272_v18  ;;  %v212_v29 = vmax.f32 %v203_v23, 0.0  ;;  %v207_v30 = vadd.f32 %v206_v27, %v73_v15  ;;  %1180 = vmatprep.subr.bf16.mxu1 %v1353_v7 }
  0xea   :  { %668 = vmatprep.subr.bf16.mxu0 %v1277_v20  ;;  %v215_v32 = vmax.f32 %v205_v26, 0.0  ;;  %vm1024_vm2 = vcmp.lt.s32.totalorder %v1023_v8, 2 }
  0xeb   :  { %v216_v33 = vmax.f32 %v207_v30, 0.0  ;;  %v1338_v30 = vld [vmem:[%s1715_s4 + $0x10] sm:$0xff]  }
  0xec   :  { %v219_v34 = vpack.c.bf16 %v215_v32, %v211_v25  ;;  %v1340_v32 = vld [vmem:[%s1715_s4 + $0x20] sm:$0xff]  }
  0xed   :  { %669 = vmatpush1.bf16.msra.mxu0 %v1275_v28  ;;  %v220_v36 = vpack.c.bf16 %v216_v33, %v212_v29  ;;  %v1336_v28 = vld [vmem:[%s1715_s4] sm:$0xff]   ;;  %v1337_v29 = vld [vmem:[%s1715_s4 + $0x8] sm:$0xff]  }
  0xee   :  { %670 = vmatprep.subr.bf16.mxu0 %v1280_v31  ;;  %v1339_v31 = vld [vmem:[%s1715_s4 + $0x18] sm:$0xff]   ;;  %v1341_v33 = vld [vmem:[%s1715_s4 + $0x28] sm:$0xff]  }
  0xef   :  { %698 = vmatprep.mubr.bf16.mxu0 %v220_v36  ;;  %v749_v36 = vsub.s32 2, %v1552_v55 }
  0xf1   :  { %671 = vmatpush1.bf16.msra.mxu0 %v1278_v35  ;;  %v1343_v35 = vld [vmem:[%s1715_s4 + $0x38] sm:$0xff]  }
  0xf2   :  { %672 = vmatprep.subr.bf16.mxu0 %v1283_v37 }
  0xf5   :  { %673 = vmatpush1.bf16.msra.mxu0 %v1281_v38  ;;  %v750_v38 = vrot.slane %v1558_v57, %v749_v36 }
  0xf6   :  { %674 = vmatprep.subr.bf16.mxu0 %v1286_v39 }
  0xf9   :  { %675 = vmatpush1.bf16.msra.mxu0 %v1284_v40 }
  0xfa   :  { %676 = vmatprep.subr.bf16.mxu0 %v1289_v41 }
  0xfd   :  { %677 = vmatpush1.bf16.msra.mxu0 %v1287_v42 }
  0xfe   :  { %678 = vmatprep.subr.bf16.mxu0 %v1292_v43 }
 0x101   :  { %679 = vmatpush1.bf16.msra.mxu0 %v1290_v44 }
 0x102   :  { %680 = vmatprep.subr.bf16.mxu0 %v1295_v45 }
 0x105   :  { %681 = vmatpush1.bf16.msra.mxu0 %v1293_v46 }
 0x106   :  { %682 = vmatprep.subr.bf16.mxu0 %v1298_v47 }
 0x109   :  { %683 = vmatpush1.bf16.msra.mxu0 %v1296_v48 }
 0x10a   :  { %684 = vmatprep.subr.bf16.mxu0 %v1301_v49  ;;  %v909_v49 = vsub.s32 3, %v1552_v55 }
 0x10d   :  { %685 = vmatpush1.bf16.msra.mxu0 %v1299_v50  ;;  %v910_v50 = vrot.slane %v1558_v57, %v909_v49 }
 0x10e   :  { %686 = vmatprep.subr.bf16.mxu0 %v1304_v51 }
 0x111   :  { %687 = vmatpush1.bf16.msra.mxu0 %v1302_v52 }
 0x112   :  { %688 = vmatprep.subr.bf16.mxu0 %v1307_v53 }
 0x115   :  { %689 = vmatpush1.bf16.msra.mxu0 %v1305_v56 }
 0x116   :  { %690 = vmatprep.subr.bf16.mxu0 %v1310_v58 }
 0x119   :  { %691 = vmatpush1.bf16.msra.mxu0 %v1308_v59 }
 0x11a   :  { %692 = vmatprep.subr.bf16.mxu0 %v1313_v60 }
 0x11d   :  { %693 = vmatpush1.bf16.msra.mxu0 %v1311_v61 }
 0x11e   :  { %694 = vmatprep.subr.bf16.mxu0 %v1316_v62 }
 0x121   :  { %695 = vmatpush1.bf16.msra.mxu0 %v1314_v63 }
 0x122   :  { %696 = vmatprep.subr.bf16.mxu0 %v1319_v0 }
 0x125   :  { %697 = vmatpush1.bf16.msra.mxu0 %v1317_v1 }
 0x128   :  { %699 = vmatmul.mubr.bf16.vlgmr.msra.gmra.mrb[0].mxu0 %v219_v34  ;;  %v1342_v34 = vld [vmem:[%s1715_s4 + $0x30] sm:$0xff]  }
 0x1fb   :  { %v700_v14 = vpop.f32.mrb[0].mxu0 }
 0x1fc   :  { %v1200_v15 = vadd.f32 %v700_v14, %v298_v12  ;;  %v702_v16 = vpop.f32.mrb[1].mxu0 }
 0x1fd   :  { %v1201_v17 = vadd.f32 %v702_v16, %v302_v13  ;;  %v704_v18 = vpop.f32.mrb[2].mxu0 }
 0x1fe   :  { %v1202_v19 = vadd.f32 %v704_v18, %v298_v12  ;;  %v706_v20 = vpop.f32.mrb[3].mxu0  ;;  %v709_v22 = vmax.f32 %v1200_v15, 0.0 }
 0x1ff   :  { %v1203_v21 = vadd.f32 %v706_v20, %v302_v13  ;;  %v710_v24 = vmax.f32 %v1201_v17, 0.0 }
 0x200   :  { %v711_v23 = vmax.f32 %v1202_v19, 0.0 }
 0x201   :  { %v712_v25 = vmax.f32 %v1203_v21, 0.0 }
 0x202   :  { %v713_v26 = vpack.c.bf16 %v711_v23, %v709_v22 }
 0x203   :  { %v714_v27 = vpack.c.bf16 %v712_v25, %v710_v24 }
 0x205   :  { %879 = vmatprep.mubr.bf16.mxu1 %v714_v27 }
 0x206   :  { %880 = vmatmul.mubr.bf16.vlgmr.msra.gmra.mrb[8].mxu1 %v713_v26 }
 0x207   :  { %1181 = vmatpush3.bf16.msra.mxu1 %v1336_v28  ;;  %1196 = vmatprep.mubr.msk.bf16.mxu1 %vm1354_vm1, %v1353_v7 }
 0x208   :  { %1182 = vmatprep.subr.bf16.mxu1 %v1353_v7 }
 0x20b   :  { %1183 = vmatpush3.bf16.msra.mxu1 %v1337_v29 }
 0x20c   :  { %1184 = vmatprep.subr.bf16.mxu1 %v1353_v7 }
 0x20f   :  { %1185 = vmatpush3.bf16.msra.mxu1 %v1338_v30 }
 0x210   :  { %1186 = vmatprep.subr.bf16.mxu1 %v1353_v7 }
 0x213   :  { %1187 = vmatpush3.bf16.msra.mxu1 %v1339_v31 }
 0x214   :  { %1188 = vmatprep.subr.bf16.mxu1 %v1353_v7 }
 0x217   :  { %1189 = vmatpush3.bf16.msra.mxu1 %v1340_v32 }
 0x218   :  { %1190 = vmatprep.subr.bf16.mxu1 %v1353_v7 }
 0x21b   :  { %1191 = vmatpush3.bf16.msra.mxu1 %v1341_v33 }
 0x21c   :  { %1192 = vmatprep.subr.bf16.mxu1 %v1353_v7 }
 0x21f   :  { %1193 = vmatpush3.bf16.msra.mxu1 %v1342_v34 }
 0x220   :  { %1194 = vmatprep.subr.bf16.mxu1 %v1353_v7 }
 0x223   :  { %1195 = vmatpush3.bf16.msra.mxu1 %v1343_v35 }
 0x2d9   :  { %v1165_v37 = vpop.f32.mrb[8].mxu1 }
 0x2da   :  { %v1166_v39 = vpop.f32.mrb[9].mxu1 }
 0x2db   :  { %v1167_v40 = vadd.f32 %v1166_v39, %v1165_v37  ;;  %v1168_v41 = vpop.f32.mrb[10].mxu1 }
 0x2dc   :  { %v1169_v42 = vpop.f32.mrb[11].mxu1 }
 0x2dd   :  { %v882_v43 = vadd.f32 %v1167_v40, %v750_v38  ;;  %v1170_v44 = vadd.f32 %v1169_v42, %v1168_v41 }
 0x2df   :  { %v885_v45 = vadd.f32 %v1170_v44, %v750_v38  ;;  %v888_v46 = vmax.f32 %v882_v43, 0.0 }
 0x2e1   :  { %v889_v47 = vmax.f32 %v885_v45, 0.0 }
 0x2e3   :  { %v890_v48 = vpack.c.bf16 %v889_v47, %v888_v46 }
 0x2e5   :  { %1197 = vmatmul.mubr.bf16.vlgmr.msra.gmra.mrb[12].mxu1 %v890_v48 }
 0x3b8   :  { %v993_v51 = vpop.f32.mrb[12].mxu1 }
 0x3b9   :  { %v994_v52 = vadd.f32 %v993_v51, %v910_v50  ;;  %v1198_v53 = vpop.f32.mrb[13].mxu1 }
 0x3ba   :  { %v996_v56 = vpop.f32.mrb[14].mxu1 }
 0x3bb   :  { %1000 = vmax.xlane.f32.xlu0 %v994_v52  ;;  %v1199_v58 = vpop.f32.mrb[15].mxu1  ;;  %v997_v59 = vadd.f32 %v996_v56, %v910_v50 }
 0x3bf   :  { %1002 = vmax.xlane.f32.xlu0 %v997_v59 }
 0x448   :  { %v1001_v60 = vpop.xlane.xlu0 %1000 }
 0x449   :  { %v1004_v61 = vsub.f32 %v994_v52, %v1001_v60 }
 0x44b   :  { %v1006_v62 = vmul.f32 1.442695, %v1004_v61 }
 0x44c   :  { %v1003_v63 = vpop.xlane.xlu0 %1002 }
 0x44d   :  { %v1005_v0 = vsub.f32 %v997_v59, %v1003_v63  ;;  %1344 = vpow2.f32 %v1006_v62 }
 0x44f   :  { %v1008_v1 = vmul.f32 1.442695, %v1005_v0 }
 0x451   :  { %1346 = vpow2.f32 %v1008_v1 }
 0x457   :  { %v1345_v2 = vpop.eup %1344 }
 0x458   :  { %1010 = vadd.xlane.f32.xlu1 %v1345_v2 }
 0x45b   :  { %v1347_v55 = vpop.eup %1346 }
 0x45c   :  { %1012 = vadd.xlane.f32.xlu1 %v1347_v55 }
 0x4e5   :  { %v1011_v57 = vpop.xlane.xlu1 %1010 }
 0x4e6   :  { %1348 = vlog2.f32 %v1011_v57 }
 0x4e9   :  { %v1013_v3 = vpop.xlane.xlu1 %1012 }
 0x4ea   :  { %1350 = vlog2.f32 %v1013_v3 }
 0x4f0   :  { %v1349_v4 = vpop.eup %1348 }
 0x4f1   :  { %v1015_v5 = vmul.f32 0.6931472, %v1349_v4 }
 0x4f3   :  { %v1018_v6 = vadd.f32 %v1015_v5, %v1001_v60 }
 0x4f4   :  { %v1351_v7 = vpop.eup %1350 }
 0x4f5   :  { %v1017_v9 = vmul.f32 0.6931472, %v1351_v7  ;;  %v1020_v10 = vsub.f32 %v994_v52, %v1018_v6 }
 0x4f7   :  { %v1019_v11 = vadd.f32 %v1017_v9, %v1003_v63  ;;  %v1025_v13 = vsel %vm1024_vm2, %v1020_v10, 0.0 }
 0x4f9   :  { %v1021_v12 = vsub.f32 %v997_v59, %v1019_v11 }
 0x4fb   :  { %v1026_v14 = vsel %vm1024_vm2, %v1021_v12, 0.0 }
 0x4fc   :  { %v1147_v15 = vpack.c.bf16 %v1026_v14, %v1025_v13 }
 0x4fe   :  { %1148 = vst [vmem:[%s1716_s6] sm:$0xff] %v1147_v15  }

</bundles_post_ra>
